<compile_context>
chip_gen: v7x
topology: tpu7x:2x2x1
jax: 0.10.0
libtpu: 0.0.40
codegen_flags: <defaults>
</compile_context>

<pallas_src>
import math

import jax
import jax.numpy as jnp
from jax.experimental import pallas as pl
from jax.experimental.pallas import tpu as pltpu


def _mlp_kernel(xT_ref, w1_ref, b1_ref, w2_ref, b2_ref, w3c_ref, b3_ref, o_ref):
    """Fused MLP tile in transposed (feature-major) layout.

    xT_ref : [n_in, tb]  one batch tile, lane axis = batch (lane-dense DMA)
    w1_ref : [h1, n_in]  PyTorch nn.Linear layout (out, in)
    b1_ref : [h1, 1]
    w2_ref : [h2, h1]
    b2_ref : [h2, 1]
    w3c_ref: [h2, 1]     last-layer weight as a column (used on the VPU)
    b3_ref : [1, 1]
    o_ref  : [1, tb]     risk scores for this tile (lane-dense output)
    """
    # Layer 1: [h1, n_in] @ [n_in, tb] -> [h1, tb]  (MXU), bias broadcast + ReLU (VPU)
    h1 = jnp.dot(w1_ref[...], xT_ref[...], preferred_element_type=jnp.float32)
    h1 = jnp.maximum(h1 + b1_ref[...], 0.0)
    # Layer 2: [h2, h1] @ [h1, tb] -> [h2, tb]
    h2 = jnp.dot(w2_ref[...], h1, preferred_element_type=jnp.float32)
    h2 = jnp.maximum(h2 + b2_ref[...], 0.0)
    # Output layer (1 unit): VPU multiply + XLU sublane reduce instead of an
    # N=1 MXU matmul; fold the scalar bias into the same expression.
    out = jnp.sum(h2 * w3c_ref[...], axis=0, keepdims=True) + b3_ref[...]  # [1, tb]
    o_ref[...] = out.astype(o_ref.dtype)


def deepsurv_forward(x, params, *, batch_tile=2048):
    """Fused forward pass of the DeepSurvIPCW MLP.

    x:      [B, n_in] float32 (PyTorch row-major sample layout)
    params: PyTorch-layout params: w1 [h1,n_in], b1 [h1], w2 [h2,h1], b2 [h2],
            w3 [1,h2], b3 [1]
    returns [B, 1] float32 risk scores
    """
    B, n_in = x.shape
    w1, b1 = params["w1"], params["b1"]
    w2, b2 = params["w2"], params["b2"]
    w3, b3 = params["w3"], params["b3"]
    h1 = w1.shape[0]
    h2 = w2.shape[0]

    # Lane-dense batch tile: multiple of 128, clamped to the padded batch.
    assert batch_tile % 128 == 0, "batch_tile must be a multiple of 128"
    b_pad_min = ((B + 127) // 128) * 128
    tb = min(batch_tile, b_pad_min)
    B_pad = ((B + tb - 1) // tb) * tb
    grid = (B_pad // tb,)

    # Feature-major (transposed) input with zero-padded batch tail: [n_in, B_pad].
    # (Padding rows are independent columns and are sliced off at the end.)
    xT = jnp.zeros((n_in, B_pad), jnp.float32).at[:, :B].set(
        x.astype(jnp.float32).T)

    w1f = w1.astype(jnp.float32)
    w2f = w2.astype(jnp.float32)
    b1c = b1.reshape(h1, 1).astype(jnp.float32)
    b2c = b2.reshape(h2, 1).astype(jnp.float32)
    w3c = w3.reshape(h2, 1).astype(jnp.float32)   # [1,h2] -> [h2,1] column
    b3c = b3.reshape(1, 1).astype(jnp.float32)

    def full(shape):
        # weights / biases: same full block every grid step (stay resident)
        return pl.BlockSpec(shape, lambda i: (0, 0))

    weight_bytes = 4 * (w1f.size + b1c.size + w2f.size + b2c.size
                        + w3c.size + b3c.size)
    cost = pl.CostEstimate(
        flops=2 * B_pad * (n_in * h1 + h1 * h2 + h2),
        transcendentals=0,
        bytes_accessed=4 * (B_pad * n_in + B_pad) + weight_bytes,
    )

    # Per-step working set: double-buffered x tile + double-buffered out tile
    # + resident weights.  Explicit limit (with generous headroom) stays within
    # the default scoped VMEM on v5e (16 MiB) / v6e (32 MiB) / v7x (32 MiB).
    vmem_needed = 2 * (n_in * tb * 4) + 2 * (tb * 4) + weight_bytes
    vmem_limit = int(min(max(4 * vmem_needed, 16 * 1024 * 1024),
                         32 * 1024 * 1024))

    outT = pl.pallas_call(
        _mlp_kernel,
        out_shape=jax.ShapeDtypeStruct((1, B_pad), jnp.float32),
        grid_spec=pltpu.PrefetchScalarGridSpec(
            num_scalar_prefetch=0,
            grid=grid,
            in_specs=[
                pl.BlockSpec((n_in, tb), lambda i: (0, i)),  # x tile over batch (lanes)
                full((h1, n_in)),
                full((h1, 1)),
                full((h2, h1)),
                full((h2, 1)),
                full((h2, 1)),
                full((1, 1)),
            ],
            out_specs=pl.BlockSpec((1, tb), lambda i: (0, i)),
        ),
        compiler_params=pltpu.CompilerParams(
            dimension_semantics=("parallel",),  # batch axis -> megacore shardable
            vmem_limit_bytes=vmem_limit,
        ),
        cost_estimate=cost,
    )(xT, w1f, b1c, w2f, b2c, w3c, b3c)

    # [1, B_pad] lane-dense row -> [B, 1] column expected by the module API.
    return outT.reshape(B_pad, 1)[:B]


def init_params(key, n_in, hidden_layers_sizes=(64, 32)):
    """PyTorch nn.Linear-style init: uniform(+-1/sqrt(fan_in)), weight [out, in]."""
    sizes = [n_in] + list(hidden_layers_sizes) + [1]
    params = {}
    for idx, (fi, fo) in enumerate(zip(sizes[:-1], sizes[1:]), start=1):
        key, kw, kb = jax.random.split(key, 3)
        bound = 1.0 / math.sqrt(fi)
        params[f"w{idx}"] = jax.random.uniform(kw, (fo, fi), jnp.float32,
                                               -bound, bound)
        params[f"b{idx}"] = jax.random.uniform(kb, (fo,), jnp.float32,
                                               -bound, bound)
    return params


def reference_forward(x, params):
    hp = jax.lax.Precision.HIGHEST
    h = jnp.maximum(jnp.dot(x, params["w1"].T, precision=hp) + params["b1"], 0.0)
    h = jnp.maximum(jnp.dot(h, params["w2"].T, precision=hp) + params["b2"], 0.0)
    return jnp.dot(h, params["w3"].T, precision=hp) + params["b3"]


if __name__ == "__main__":
    key = jax.random.PRNGKey(0)
    B, n_in = 300, 16                    # ragged batch -> exercises pad + 3 grid steps
    kx, kp = jax.random.split(key)
    x = jax.random.normal(kx, (B, n_in), jnp.float32)
    params = init_params(kp, n_in, hidden_layers_sizes=(64, 32))

    out = deepsurv_forward(x, params, batch_tile=128)
    out = jax.block_until_ready(out)

    ref = reference_forward(x, params)
    assert out.shape == (B, 1)
    assert jnp.allclose(out, ref, atol=1e-4, rtol=1e-4), "mismatch vs reference"

    print("KERNEL_OK")
</pallas_src>

<mosaic_0001>
module attributes {stable_mosaic.version = 11 : i64} {
  func.func @_mlp_kernel(%arg0: i32, %arg1: memref<16x128xf32, #tpu.memory_space<vmem>>, %arg2: memref<64x16xf32, #tpu.memory_space<vmem>>, %arg3: memref<64x1xf32, #tpu.memory_space<vmem>>, %arg4: memref<32x64xf32, #tpu.memory_space<vmem>>, %arg5: memref<32x1xf32, #tpu.memory_space<vmem>>, %arg6: memref<32x1xf32, #tpu.memory_space<vmem>>, %arg7: memref<1x1xf32, #tpu.memory_space<vmem>>, %arg8: memref<1x128xf32, #tpu.memory_space<vmem>>) attributes {dimension_semantics = [#tpu.dimension_semantics<parallel>], iteration_bounds = array<i64: 3>, scalar_prefetch = 0 : i64, scratch_operands = 0 : i64, tpu.core_type = #tpu.core_type<tc>, window_params = [{transform_indices = @transform_0, window_bounds = array<i64: 16, 128>}, {pipeline_mode = #tpu.pipeline_mode<synchronous>, transform_indices = @transform_1, window_bounds = array<i64: 64, 16>}, {pipeline_mode = #tpu.pipeline_mode<synchronous>, transform_indices = @transform_2, window_bounds = array<i64: 64, 1>}, {pipeline_mode = #tpu.pipeline_mode<synchronous>, transform_indices = @transform_3, window_bounds = array<i64: 32, 64>}, {pipeline_mode = #tpu.pipeline_mode<synchronous>, transform_indices = @transform_4, window_bounds = array<i64: 32, 1>}, {pipeline_mode = #tpu.pipeline_mode<synchronous>, transform_indices = @transform_5, window_bounds = array<i64: 32, 1>}, {pipeline_mode = #tpu.pipeline_mode<synchronous>, transform_indices = @transform_6, window_bounds = array<i64: 1, 1>}, {transform_indices = @transform_7, window_bounds = array<i64: 1, 128>}]} {
    %c0 = arith.constant 0 : index
    %c0_0 = arith.constant 0 : index
    %0 = vector.load %arg2[%c0, %c0_0] : memref<64x16xf32, #tpu.memory_space<vmem>>, vector<64x16xf32>
    %c0_1 = arith.constant 0 : index
    %c0_2 = arith.constant 0 : index
    %1 = vector.load %arg1[%c0_1, %c0_2] : memref<16x128xf32, #tpu.memory_space<vmem>>, vector<16x128xf32>
    %cst = arith.constant dense<0.000000e+00> : vector<64x128xf32>
    %2 = tpu.matmul %0, %1, %cst {dimension_numbers = #tpu.dot_dimension_numbers<[1], [0], [0], [1], [0, 0, 1, 1], [], []>} : vector<64x16xf32>, vector<16x128xf32>, vector<64x128xf32> -> vector<64x128xf32>
    %c0_3 = arith.constant 0 : index
    %c0_4 = arith.constant 0 : index
    %3 = vector.load %arg3[%c0_3, %c0_4] : memref<64x1xf32, #tpu.memory_space<vmem>>, vector<64x1xf32>
    %4 = vector.broadcast %3 : vector<64x1xf32> to vector<64x128xf32>
    %5 = arith.addf %2, %4 : vector<64x128xf32>
    %cst_5 = arith.constant 0.000000e+00 : f32
    %6 = vector.broadcast %cst_5 : f32 to vector<64x128xf32>
    %7 = arith.maximumf %5, %6 : vector<64x128xf32>
    %c0_6 = arith.constant 0 : index
    %c0_7 = arith.constant 0 : index
    %8 = vector.load %arg4[%c0_6, %c0_7] : memref<32x64xf32, #tpu.memory_space<vmem>>, vector<32x64xf32>
    %cst_8 = arith.constant dense<0.000000e+00> : vector<32x128xf32>
    %9 = tpu.matmul %8, %7, %cst_8 {dimension_numbers = #tpu.dot_dimension_numbers<[1], [0], [0], [1], [0, 0, 1, 1], [], []>} : vector<32x64xf32>, vector<64x128xf32>, vector<32x128xf32> -> vector<32x128xf32>
    %c0_9 = arith.constant 0 : index
    %c0_10 = arith.constant 0 : index
    %10 = vector.load %arg5[%c0_9, %c0_10] : memref<32x1xf32, #tpu.memory_space<vmem>>, vector<32x1xf32>
    %11 = vector.broadcast %10 : vector<32x1xf32> to vector<32x128xf32>
    %12 = arith.addf %9, %11 : vector<32x128xf32>
    %cst_11 = arith.constant 0.000000e+00 : f32
    %13 = vector.broadcast %cst_11 : f32 to vector<32x128xf32>
    %14 = arith.maximumf %12, %13 : vector<32x128xf32>
    %c0_12 = arith.constant 0 : index
    %c0_13 = arith.constant 0 : index
    %15 = vector.load %arg6[%c0_12, %c0_13] : memref<32x1xf32, #tpu.memory_space<vmem>>, vector<32x1xf32>
    %16 = vector.broadcast %15 : vector<32x1xf32> to vector<32x128xf32>
    %17 = arith.mulf %14, %16 : vector<32x128xf32>
    %cst_14 = arith.constant dense<0.000000e+00> : vector<128xf32>
    %18 = vector.multi_reduction <add>, %17, %cst_14 [0] : vector<32x128xf32> to vector<128xf32>
    %19 = vector.shape_cast %18 : vector<128xf32> to vector<1x128xf32>
    %c0_15 = arith.constant 0 : index
    %c0_16 = arith.constant 0 : index
    %20 = vector.load %arg7[%c0_15, %c0_16] : memref<1x1xf32, #tpu.memory_space<vmem>>, vector<1x1xf32>
    %21 = vector.broadcast %20 : vector<1x1xf32> to vector<1x128xf32>
    %22 = arith.addf %19, %21 : vector<1x128xf32>
    %c0_17 = arith.constant 0 : index
    %c0_18 = arith.constant 0 : index
    %23 = vector.load %arg8[%c0_17, %c0_18] : memref<1x128xf32, #tpu.memory_space<vmem>>, vector<1x128xf32>
    tpu.vector_store %arg8[%c0_17, %c0_18], %22 {strides = array<i32>} : memref<1x128xf32, #tpu.memory_space<vmem>>, vector<1x128xf32>,
    return
  }
  func.func @transform_0(%arg0: i32) -> (i32, i32) {
    %c0_i32 = arith.constant 0 : i32
    %c0_i32_0 = arith.constant 0 : i32
    return %c0_i32, %arg0 : i32, i32
  }
  func.func @transform_1(%arg0: i32) -> (i32, i32) {
    %c0_i32 = arith.constant 0 : i32
    %c0_i32_0 = arith.constant 0 : i32
    %c0_i32_1 = arith.constant 0 : i32
    return %c0_i32, %c0_i32_0 : i32, i32
  }
  func.func @transform_2(%arg0: i32) -> (i32, i32) {
    %c0_i32 = arith.constant 0 : i32
    %c0_i32_0 = arith.constant 0 : i32
    %c0_i32_1 = arith.constant 0 : i32
    return %c0_i32, %c0_i32_0 : i32, i32
  }
  func.func @transform_3(%arg0: i32) -> (i32, i32) {
    %c0_i32 = arith.constant 0 : i32
    %c0_i32_0 = arith.constant 0 : i32
    %c0_i32_1 = arith.constant 0 : i32
    return %c0_i32, %c0_i32_0 : i32, i32
  }
  func.func @transform_4(%arg0: i32) -> (i32, i32) {
    %c0_i32 = arith.constant 0 : i32
    %c0_i32_0 = arith.constant 0 : i32
    %c0_i32_1 = arith.constant 0 : i32
    return %c0_i32, %c0_i32_0 : i32, i32
  }
  func.func @transform_5(%arg0: i32) -> (i32, i32) {
    %c0_i32 = arith.constant 0 : i32
    %c0_i32_0 = arith.constant 0 : i32
    %c0_i32_1 = arith.constant 0 : i32
    return %c0_i32, %c0_i32_0 : i32, i32
  }
  func.func @transform_6(%arg0: i32) -> (i32, i32) {
    %c0_i32 = arith.constant 0 : i32
    %c0_i32_0 = arith.constant 0 : i32
    %c0_i32_1 = arith.constant 0 : i32
    return %c0_i32, %c0_i32_0 : i32, i32
  }
  func.func @transform_7(%arg0: i32) -> (i32, i32) {
    %c0_i32 = arith.constant 0 : i32
    %c0_i32_0 = arith.constant 0 : i32
    return %c0_i32, %arg0 : i32, i32
  }
}

</mosaic_0001>

<bundles_post_ra>
// kernel: tpu_custom_call.1
= control target key start
LH: loop header
LB: loop body
LE: loop exit
PB: predicated region body
PF: predicated region fallthrough
CT: control target
= control target key end

     0   :  { %s1221_s0 = inlined_call_operand.vmem [shape: f32[16,384], index: 0, kind: input, shape index: {}]   ;;  %s1222_s1 = inlined_call_operand.vmem [shape: f32[64,16], index: 1, kind: input, shape index: {}]   ;;  %s1223_s2 = inlined_call_operand.vmem [shape: f32[64,1], index: 2, kind: input, shape index: {}]   ;;  %s1224_s3 = inlined_call_operand.vmem [shape: f32[32,64], index: 3, kind: input, shape index: {}]   ;;  %s1225_s4 = inlined_call_operand.vmem [shape: f32[32,1], index: 4, kind: input, shape index: {}]   ;;  %s1226_s5 = inlined_call_operand.vmem [shape: f32[32,1], index: 5, kind: input, shape index: {}]   ;;  %s1227_s6 = inlined_call_operand.<no memory space> [shape: f32[1,1], index: 6, kind: input, shape index: {}]   ;;  %s1228_s7 = inlined_call_operand.hbm [shape: f32[1,384], index: 7, kind: output, shape index: {}]  }
   0x1   :  { %v12_v0 = vstv %s1227_s6 }
   0x2   :  { %13 = vst [vmem:[#allocation2] sm:$0x1] %v12_v0 }
   0x3   :  { %14 = vsyncpa [#allocation5], 0 }
   0x4   :  { %16 = vsyncpa [#allocation5 + $0x1], 0  ;;  %s1018_s26 = smov 0   ;;  %s1020_s27 = smov 0  }
   0x5   :  { %s1022_s28 = smov 0   ;;  %s1024_s29 = smov 0  }
   0x6 LB: > { %s764_s6 = sadd.s32 4294967295, %s971_s29   ;;  %s765_s30 = sadd.s32 4294967294, %s971_s29   ;;  %s971_s29 = sphi %s1024_s29, %s1234_s29   ;;  %s967_s28 = sphi %s1022_s28, %s1233_s28   ;;  %s963_s27 = sphi %s1020_s27, %s1232_s27   ;;  %s959_s26 = sphi %s1018_s26, %s1231_s26  }
   0x7   : > { %s1041_s8 = sadd.s32 1, %s971_s29   ;;  %s29_s9 = sadd.s32 1, %s967_s28 }
   0x8   : > { %s26_s10 = ssub.s32 %s971_s29, %s1041_s8  ;;  %p36_p0 = scmp.ne.s32.totalorder %s967_s28, %s963_s27 }
   0x9   : > { %p27_p1 = scmp.eq.s32.totalorder %s26_s10, 0  ;;  %p37_p2 = scmp.eq.s32.totalorder %s971_s29, 0 }
   0xa   : > { %p192_p3 = scmp.eq.s32.totalorder %s764_s6, 2  ;;  %p197_p4 = scmp.ne.s32.totalorder %s963_s27, %s959_s26 }
   0xb   : > { %s1054_s11 = scalar_select %p27_p1, %s967_s28, %s29_s9  }
   0xc   : > { %p38_p5 = por %p37_p2, %p36_p0  ;;  %p1056_p6 = por %p192_p3, %p36_p0 }
   0xd   : > { %p198_p7 = scmp.eq.s32.totalorder %s765_s30, 2  ;;  %p767_p9 = scmp.ge.s32.totalorder %s971_s29, 3 }
   0xf   : > { %p1060_p8 = por %p198_p7, %p197_p4  ;;  %232 = sbr.rel (%p767_p9) target bundleno = 29 (0x1d), region = 40 }
  0x16   : > { %235 = sbr.rel (!%p38_p5) target bundleno = 29 (0x1d), region = 44  ;;  %s237_s14 = sand.u32 (%p38_p5), 1, %s967_s28  }
  0x17   : > { %s769_s15 = sshll.u32 (%p38_p5), %s971_s29, 3  ;;  %s768_s16 = sshll.u32 (%p38_p5), %s237_s14, 4 }
  0x18   : > { %s241_s19 = scalar_lea.vmem (%p38_p5), %s1221_s0, %s769_s15  ;;  %s239_s20 = scalar_lea.vmem (%p38_p5), [#allocation3], %s768_s16 }
  0x19   : > { %v271_v1 = vld [vmem:[%s241_s19] sm:$0xff] (%p38_p5)  ;;  %v273_v2 = vld [vmem:[%s241_s19 + $0x18] sm:$0xff] (%p38_p5) }
  0x1a   : > { %272 = vst [vmem:[%s239_s20] sm:$0xff] (%p38_p5), %v271_v1  ;;  %274 = vst [vmem:[%s239_s20 + $0x8] sm:$0xff] (%p38_p5), %v273_v2 }
  0x1d PF: > { %p770_p10 = scmp.ge.s32.totalorder %s971_s29, 1  ;;  %p279_p11 = scmp.lt.s32.totalorder %s971_s29, 4 }
  0x1f   : > { %p280_p12 = pnand %p770_p10, %p279_p11 }
  0x20   : > { %s1073_s21 = sand.u32 (!%p280_p12), 1, %s963_s27   ;;  %v316_v3 = vld [vmem:[%s1222_s1] sm:$0xff] (!%p280_p12)  ;;  %vm374_vm0 = vcmask (!%p280_p12), 130048   ;;  %v973_v4 = vmov (!%p280_p12), 0   ;;  %v327_v9 = vld [vmem:[%s1223_s2 + $0x8] sm:$0xff] (!%p280_p12)  ;;  %v328_v10 = vld [vmem:[%s1223_s2 + $0x10] sm:$0xff] (!%p280_p12) }
  0x21   : > { %283 = sbr.rel (%p280_p12) target bundleno = 532 (0x214), region = 82  ;;  %s771_s24 = sshll.u32 (!%p280_p12), %s1073_s21, 4  ;;  %813 = vmatprep.mubr.msk.f32.mxu0 (!%p280_p12), %vm374_vm0, %v316_v3  ;;  %907 = vset.pattern.permute.xlu0 (!%p280_p12), %v973_v4  ;;  %v326_v5 = vld [vmem:[%s1223_s2] sm:$0xff] (!%p280_p12)  ;;  %v329_v11 = vld [vmem:[%s1223_s2 + $0x18] sm:$0xff] (!%p280_p12)  ;;  %v317_v12 = vld [vmem:[%s1222_s1 + $0x8] sm:$0xff] (!%p280_p12)  ;;  %vm540_vm1 = vcmask (!%p280_p12), 523264  }
  0x22   : > { %908 = vset.pattern.permute.xlu1 (!%p280_p12), %v973_v4  ;;  %s288_s9 = scalar_lea.vmem (!%p280_p12), [#allocation3], %s771_s24  ;;  %336 = vperm.xlu0 (!%p280_p12), %907, %v326_v5   ;;  %v318_v13 = vld [vmem:[%s1222_s1 + $0x10] sm:$0xff] (!%p280_p12)  ;;  %v330_v14 = vld [vmem:[%s1223_s2 + $0x20] sm:$0xff] (!%p280_p12)  ;;  %v331_v15 = vld [vmem:[%s1223_s2 + $0x28] sm:$0xff] (!%p280_p12)  ;;  %s784_s24 = sshll.u32 (!%p280_p12), %s764_s6, 4 }
  0x23   : > { %v324_v6 = vld [vmem:[%s288_s9] sm:$0xff] (!%p280_p12)  ;;  %v325_v7 = vld [vmem:[%s288_s9 + $0x8] sm:$0xff] (!%p280_p12)  ;;  %346 = vperm.xlu1 (!%p280_p12), %908, %v328_v10   ;;  %s315_s25 = scalar_lea.vmem (!%p280_p12), [#allocation4], %s1073_s21  ;;  %s1178_s14 = scalar_lea.hbm (!%p280_p12), %s1228_s7, %s784_s24 }
  0x24   : > { %v847_v8 = vpack.c.bf16 (!%p280_p12), %v325_v7, %v324_v6  ;;  %v319_v16 = vld [vmem:[%s1222_s1 + $0x18] sm:$0xff] (!%p280_p12)  ;;  %v320_v17 = vld [vmem:[%s1222_s1 + $0x20] sm:$0xff] (!%p280_p12)  ;;  %v332_v18 = vld [vmem:[%s1223_s2 + $0x30] sm:$0xff] (!%p280_p12)  ;;  %s704_s30 = sshll.u32 (!%p280_p12), %s315_s25, 4  ;;  %s692_s15 = scalar_lea.sflag (!%p280_p12), [#allocation5], %s1073_s21  ;;  %s1180_s30 = int_to_ptr.vmem [resolvable:$true] %s704_s30 }
  0x25   : > { %v333_v19 = vld [vmem:[%s1223_s2 + $0x38] sm:$0xff] (!%p280_p12)  ;;  %v321_v20 = vld [vmem:[%s1222_s1 + $0x28] sm:$0xff] (!%p280_p12)  ;;  %v322_v21 = vld [vmem:[%s1222_s1 + $0x30] sm:$0xff] (!%p280_p12)  ;;  %s909_s16 = scalar_lea.vmem (!%p280_p12), %s1180_s30, 16  ;;  %s974_s6 = smov (!%p280_p12), [#allocation4]  }
  0x26   : > { %848 = vmatprep.subr.bf16.mxu0 (!%p280_p12), %v847_v8  ;;  %341 = vperm.xlu0 (!%p280_p12), %907, %v327_v9   ;;  %v516_v22 = vld [vmem:[%s1225_s4] sm:$0xff] (!%p280_p12)  ;;  %v517_v23 = vld [vmem:[%s1225_s4 + $0x8] sm:$0xff] (!%p280_p12)  ;;  %v323_v24 = vld [vmem:[%s1222_s1 + $0x38] sm:$0xff] (!%p280_p12)  ;;  %p910_p13 = scmp.ne.s32.totalorder (!%p280_p12), %s1180_s30, %s909_s16  ;;  %s913_s17 = sshll.u32 (!%p280_p12), %s974_s6, 4  ;;  %s914_s17 = int_to_ptr.vmem [resolvable:$false] %s913_s17 }
  0x27   : > { %850 = vmatpush3.bf16.msra.mxu0 (!%p280_p12), %v847_v8  ;;  %351 = vperm.xlu1 (!%p280_p12), %908, %v329_v11   ;;  %v518_v25 = vld [vmem:[%s1225_s4 + $0x10] sm:$0xff] (!%p280_p12)  ;;  %v519_v26 = vld [vmem:[%s1225_s4 + $0x18] sm:$0xff] (!%p280_p12)  ;;  %v642_v27 = vld [vmem:[%s1226_s5] sm:$0xff] (!%p280_p12)  ;;  %s915_s18 = scalar_lea.vmem (!%p280_p12), %s914_s17, 32  ;;  %p916_p2 = scmp.lt.s32.totalorder (!%p280_p12), %s1180_s30, %s914_s17 }
  0x28   : > { %v643_v28 = vld [vmem:[%s1226_s5 + $0x8] sm:$0xff]  ;;  %v644_v29 = vld [vmem:[%s1226_s5 + $0x10] sm:$0xff]  ;;  %v645_v30 = vld [vmem:[%s1226_s5 + $0x18] sm:$0xff]  ;;  %p911_p0 = pnand %p910_p13, %p1056_p6  ;;  %p917_p3 = scmp.lt.s32.totalorder %s915_s18, %s909_s16 }
  0x29   : > { %v679_v31 = vld [vmem:[#allocation2] sm:$0x1]  ;;  %v513_v5 = vld [vmem:[%s1224_s3 + $0x8] sm:$0xff]  ;;  %v514_v6 = vld [vmem:[%s1224_s3 + $0x10] sm:$0xff] }
  0x2a   : > { %814 = vmatmul.mubr.msk.f32.vlgmr.msra.gmra.mrb[0].mxu0 %vm374_vm0, %v317_v12  ;;  %356 = vperm.xlu0 %907, %v330_v14   ;;  %v512_v32 = vld [vmem:[%s1224_s3] sm:$0xff]  ;;  %v515_v7 = vld [vmem:[%s1224_s3 + $0x18] sm:$0xff]  ;;  %p912_p1 = pneg %p911_p0  ;;  %p918_p4 = por %p917_p3, %p916_p2 }
  0x2b   : > { %816 = vmatprep.mubr.msk.f32.mxu0 %vm374_vm0, %v318_v13  ;;  %361 = vperm.xlu1 %908, %v331_v15  }
  0x2c   : > { %841 = vmatprep.mubr.msk.f32.mxu1 %vm540_vm1, %v512_v32  ;;  %p919_p5 = pnand %p918_p4, %p912_p1 }
  0x2e   : > { %817 = vmatmul.mubr.msk.f32.gmra.mrb[2].mxu0 %vm374_vm0, %v319_v16  ;;  %366 = vperm.xlu0 %907, %v332_v18  }
  0x2f   : > { %819 = vmatprep.mubr.msk.f32.mxu0 %vm374_vm0, %v320_v17  ;;  %371 = vperm.xlu1 %908, %v333_v19  }
  0x32   : > { %820 = vmatmul.mubr.msk.f32.gmra.mrb[4].mxu0 %vm374_vm0, %v321_v20  ;;  %522 = vperm.xlu0 %907, %v516_v22  }
  0x33   : > { %822 = vmatprep.mubr.msk.f32.mxu0 %vm374_vm0, %v322_v21  ;;  %527 = vperm.xlu1 %908, %v517_v23  }
  0x36   : > { %823 = vmatmul.mubr.msk.f32.gmra.mrb[6].mxu0 %vm374_vm0, %v323_v24  ;;  %532 = vperm.xlu0 %907, %v518_v25  }
  0x37   : > { %537 = vperm.xlu1 %908, %v519_v26  }
  0x3a   : > { %648 = vperm.xlu0 %907, %v642_v27  }
  0x3b   : > { %653 = vperm.xlu1 %908, %v643_v28  }
  0x3e   : > { %658 = vperm.xlu0 %907, %v644_v29  }
  0x3f   : > { %663 = vperm.xlu1 %908, %v645_v30  }
  0x42   : > { %682 = vperm.xlu0 %907, %v679_v31  }
  0xa1   : > { %v337_v33 = vpop.permute.xlu0 %336 }
  0xa2   : > { %v347_v34 = vpop.permute.xlu1 %346 }
  0xa5   : > { %v342_v35 = vpop.permute.xlu0 %341 }
  0xa6   : > { %v352_v36 = vpop.permute.xlu1 %351 }
  0xa9   : > { %v357_v49 = vpop.permute.xlu0 %356 }
  0xaa   : > { %v362_v46 = vpop.permute.xlu1 %361 }
  0xad   : > { %v367_v61 = vpop.permute.xlu0 %366 }
  0xae   : > { %v372_v58 = vpop.permute.xlu1 %371 }
  0xb1   : > { %v523_v8 = vpop.permute.xlu0 %522 }
  0xb2   : > { %v528_v9 = vpop.permute.xlu1 %527 }
  0xb5   : > { %v533_v10 = vpop.permute.xlu0 %532 }
  0xb6   : > { %v538_v11 = vpop.permute.xlu1 %537 }
  0xb9   : > { %v649_v16 = vpop.permute.xlu0 %648 }
  0xba   : > { %v654_v18 = vpop.permute.xlu1 %653 }
  0xbd   : > { %v659_v29 = vpop.permute.xlu0 %658 }
  0xbe   : > { %v664_v31 = vpop.permute.xlu1 %663 }
  0xfd   : > { %v815_v37 = vpop.f32.mrb[0].mxu0 }
  0xfe   : > { %v471_v38 = vadd.f32 %v815_v37, %v342_v35  ;;  %v465_v39 = vpop.f32.mrb[1].mxu0 }
  0xff   : > { %v466_v40 = vadd.f32 %v465_v39, %v337_v33 }
 0x100   : > { %v505_v41 = vmax.f32 %v471_v38, 0.0 }
 0x101   : > { %v504_v42 = vmax.f32 %v466_v40, 0.0  ;;  %v818_v43 = vpop.f32.mrb[2].mxu0 }
 0x102   : > { %v481_v44 = vadd.f32 %v818_v43, %v352_v36  ;;  %v475_v45 = vpop.f32.mrb[3].mxu0 }
 0x103   : > { %v476_v47 = vadd.f32 %v475_v45, %v347_v34  ;;  %v851_v48 = vpack.c.bf16 %v505_v41, %v504_v42  ;;  %v685_v34 = vlaneseq  ;;  %v683_v42 = vpop.permute.xlu0 %682 }
 0x104   : > { %v507_v50 = vmax.f32 %v481_v44, 0.0 }
 0x105   : > { %v506_v51 = vmax.f32 %v476_v47, 0.0  ;;  %v821_v52 = vpop.f32.mrb[4].mxu0  ;;  %852 = vmatprep.subr.bf16.mxu1 %v851_v48  ;;  %v686_v37 = vshrl.u32 %v685_v34, 7 }
 0x106   : > { %v491_v53 = vadd.f32 %v821_v52, %v362_v46  ;;  %v485_v54 = vpop.f32.mrb[5].mxu0  ;;  %854 = vmatpush3.bf16.msra.mxu1 %v851_v48 }
 0x107   : > { %v855_v55 = vpack.c.bf16 %v507_v50, %v506_v51  ;;  %v486_v56 = vadd.f32 %v485_v54, %v357_v49  ;;  %v687_v40 = vsub.s32 0, %v686_v37 }
 0x108   : > { %v509_v57 = vmax.f32 %v491_v53, 0.0 }
 0x109   : > { %v508_v59 = vmax.f32 %v486_v56, 0.0  ;;  %v824_v60 = vpop.f32.mrb[6].mxu0  ;;  %856 = vmatprep.subr.bf16.mxu1 %v855_v55  ;;  %v688_v44 = vrot.slane %v683_v42, %v687_v40 }
 0x10a   : > { %v501_v62 = vadd.f32 %v824_v60, %v372_v58  ;;  %v495_v63 = vpop.f32.mrb[7].mxu0  ;;  %858 = vmatpush3.bf16.msra.mxu1 %v855_v55 }
 0x10b   : > { %v859_v0 = vpack.c.bf16 %v509_v57, %v508_v59  ;;  %v496_v1 = vadd.f32 %v495_v63, %v367_v61 }
 0x10c   : > { %v511_v2 = vmax.f32 %v501_v62, 0.0 }
 0x10d   : > { %v510_v3 = vmax.f32 %v496_v1, 0.0  ;;  %860 = vmatprep.subr.bf16.mxu1 %v859_v0 }
 0x10e   : > { %862 = vmatpush3.bf16.msra.mxu1 %v859_v0 }
 0x10f   : > { %v863_v4 = vpack.c.bf16 %v511_v2, %v510_v3 }
 0x111   : > { %864 = vmatprep.subr.bf16.mxu1 %v863_v4 }
 0x112   : > { %866 = vmatpush3.bf16.msra.mxu1 %v863_v4 }
 0x115   : > { %842 = vmatmul.mubr.msk.f32.vlgmr.msra.gmra.mrb[0].mxu1 %vm540_vm1, %v513_v5 }
 0x116   : > { %844 = vmatprep.mubr.msk.f32.mxu1 %vm540_vm1, %v514_v6 }
 0x119   : > { %845 = vmatmul.mubr.msk.f32.gmra.mrb[2].mxu1 %vm540_vm1, %v515_v7 }
 0x1e8   : > { %v843_v12 = vpop.f32.mrb[0].mxu1 }
 0x1e9   : > { %v625_v13 = vadd.f32 %v843_v12, %v528_v9  ;;  %v619_v14 = vpop.f32.mrb[1].mxu1 }
 0x1ea   : > { %v620_v15 = vadd.f32 %v619_v14, %v523_v8 }
 0x1eb   : > { %v639_v17 = vmax.f32 %v625_v13, 0.0 }
 0x1ec   : > { %v638_v19 = vmax.f32 %v620_v15, 0.0  ;;  %v846_v20 = vpop.f32.mrb[2].mxu1 }
 0x1ed   : > { %v667_v21 = vmul.f32 %v654_v18, %v639_v17  ;;  %v635_v22 = vadd.f32 %v846_v20, %v538_v11  ;;  %v629_v23 = vpop.f32.mrb[3].mxu1 }
 0x1ee   : > { %v666_v24 = vmul.f32 %v649_v16, %v638_v19  ;;  %v630_v25 = vadd.f32 %v629_v23, %v533_v10 }
 0x1ef   : > { %v641_v27 = vmax.f32 %v635_v22, 0.0 }
 0x1f0   : > { %v670_v26 = vadd.f32 %v667_v21, %v666_v24  ;;  %v640_v28 = vmax.f32 %v630_v25, 0.0 }
 0x1f1   : > { %v669_v32 = vmul.f32 %v664_v31, %v641_v27 }
 0x1f2   : > { %v668_v30 = vmul.f32 %v659_v29, %v640_v28 }
 0x1f4   : > { %v671_v33 = vadd.f32 %v670_v26, %v668_v30 }
 0x1f6   : > { %v672_v35 = vadd.f32 %v671_v33, %v669_v32 }
 0x1f8   : > { %v673_v36 = vrot.slane %v672_v35, 4 }
 0x1fa   : > { %v674_v38 = vadd.f32 %v673_v36, %v672_v35 }
 0x1fc   : > { %v675_v39 = vrot.slane %v674_v38, 2 }
 0x1fe   : > { %v676_v41 = vadd.f32 %v675_v39, %v674_v38 }
 0x200   : > { %v677_v43 = vrot.slane %v676_v41, 1 }
 0x202   : > { %v678_v45 = vadd.f32 %v677_v43, %v676_v41 }
 0x204   : > { %v689_v46 = vadd.f32 %v688_v44, %v678_v45 }
 0x206   : > { %690 = vst [vmem:[%s315_s25] sm:$0x1] %v689_v46 }
 0x207   : > { %922 = shalt.err (!%p919_p5)
}
 0x208   : > { %s923_s21 = scalar_lea.hbm %s1178_s14, 16  ;;  %s927_s22 = scalar_lea.hbm %s1228_s7, 48 }
 0x209   : > { %p924_p7 = scmp.ne.s32.totalorder %s1178_s14, %s923_s21  ;;  %p928_p11 = scmp.lt.u32.totalorder %s1178_s14, %s1228_s7 }
 0x20a   : > { %p929_p12 = scmp.lt.u32.totalorder %s927_s22, %s923_s21  ;;  %p931_p0 = scmp.lt.u32.totalorder %s923_s21, %s1178_s14 }
 0x20b   : > { %p925_p9 = pnand %p924_p7, %p1056_p6 }
 0x20c   : > { %p930_p13 = por %p929_p12, %p928_p11 }
 0x20d   : > { %p926_p10 = pneg %p925_p9 }
 0x20e   : > { %p932_p1 = por %p931_p0, %p930_p13 }
 0x210   : > { %p933_p2 = pnand %p932_p1, %p926_p10 }
 0x212   : > { %936 = shalt.err (!%p933_p2)
}
 0x213   : > { %867 = dma.vmem_to_hbm [thread:$0]  (%p1056_p6), %s1180_s30, 16, %s1178_s14, %s692_s15  }
 0x214 PF: > { %p873_p3 = scmp.ge.s32.totalorder %s971_s29, 2  ;;  %s716_s25 = sand.u32 1, %s959_s26  }
 0x215   : > { %s717_s9 = scalar_lea.sflag [#allocation5], %s716_s25 }
 0x216   : > { %p870_p4 = pnand %p873_p3, %p1060_p8 }
 0x218   : > { %954 = dma.done.wait (!%p870_p4), %s717_s9, 16  }
 0x219   : > { %956 = vsyncadd (!%p870_p4), %s717_s9, 4294967280  ;;  %p19_p5 = scmp.ge.s32.totalorder %s1041_s8, 5   ;;  %s1231_s26 = smov %s963_s27 }
 0x21a   : > { %s1232_s27 = smov %s967_s28  ;;  %s1233_s28 = smov %s1054_s11 }
 0x21b   : > { %s1234_s29 = smov %s1041_s8  ;;  %21 = sbr.rel (!%p19_p5) target bundleno = 6 (0x6), region = 126 }
 0x222   :  { %721 = vsyncpa [#allocation5], 1 }
 0x223   :  { %723 = vsyncpa [#allocation5 + $0x1], 1 }

</bundles_post_ra>
